<compile_context>
chip_gen: v5e
topology: v5e:2x2
jax: 0.10.0
libtpu: 0.0.40
codegen_flags: <defaults>
</compile_context>

<pallas_src>
import functools

import jax
import jax.numpy as jnp
from jax.experimental import pallas as pl
from jax.experimental.pallas import tpu as pltpu


def _round_up(v, m):
    return ((v + m - 1) // m) * m


def _cdiv(a, b):
    return (a + b - 1) // b


def _saaf_kernel(x_ref, v1_ref, wh_ref, ww_ref, o_ref, *, widths, a0):
    """Elementwise SAAF-c2 hot path (branch-free, carried ReLU remainder).

    x_ref : (TB, TC)  activation tile
    v1_ref: (1,  TC)  linear-term weights
    wh_ref: (n,  TC)  0.5 * w[k]
    ww_ref: (n,  TC)  (b_k - a_k) * w[k]
    o_ref : (TB, TC)  output tile
    """
    n_seg = len(widths)

    x = x_ref[...].astype(jnp.float32)
    res = v1_ref[...].astype(jnp.float32) * x          # linear term

    # Segment 0: full clip of (x - a_0) into [0, width_0].
    d = x - a0
    t = jnp.clip(d, 0.0, widths[0])
    d = d - widths[0]                                   # d = x - b_0
    tail = jnp.maximum(d, 0.0)                          # relu(x - b_0)
    res = res + wh_ref[0:1, :] * (t * t) + ww_ref[0:1, :] * tail

    # Segments k >= 1: t_k = clip(x - a_k, 0, width_k) == min(tail_{k-1}, width_k)
    # (tail_{k-1} = relu(x - a_k) since b_{k-1} == a_k) -> saves one VALU op.
    for k in range(1, n_seg):                           # n_seg small & static -> unrolled
        wk = widths[k]
        t = jnp.minimum(tail, wk)
        d = d - wk                                      # d = x - b_k
        tail = jnp.maximum(d, 0.0)
        res = res + wh_ref[k:k + 1, :] * (t * t) + ww_ref[k:k + 1, :] * tail

    o_ref[...] = res.astype(o_ref.dtype)


def saaf_c2(x, v1, w, breakpoints, *, target_tile_bytes=4 * 1024 * 1024,
            max_tile_c=512, max_tile_b=2048):
    """Apply SAAFc2 to x of shape (B, C). No pad/slice of x; ragged-grid tiling."""
    B, C = x.shape
    n_seg = len(breakpoints) - 1
    assert w.shape == (n_seg, C)
    assert v1.shape == (1, C)

    bps = [float(t) for t in breakpoints]
    assert all(b2 > b1 for b1, b2 in zip(bps, bps[1:])), \
        "breakpoints must be strictly increasing"
    widths = tuple(bps[k + 1] - bps[k] for k in range(n_seg))

    # ---- tile sizes --------------------------------------------------------
    # Lane (C) tile: multiple of 128 (unmasked vst), last tile nearly full.
    nc = _cdiv(C, max_tile_c)
    tc = min(_round_up(_cdiv(C, nc), 128), _round_up(C, 128))
    nc = _cdiv(C, tc)

    # Sublane (B) tile: area-based (~target_tile_bytes f32), last tile nearly full.
    tb_budget = max(8, min(max_tile_b, target_tile_bytes // (tc * 4)))
    nb = _cdiv(B, tb_budget)
    tb = min(_round_up(_cdiv(B, nb), 8), _round_up(B, 8))
    nb = _cdiv(B, tb)

    # v7x has 2 TensorCores: keep at least 2 blocks along a parallel axis
    # when the batch is large enough to split.
    if nb * nc == 1 and B > 8:
        tb = _round_up(_cdiv(B, 2), 8)
        nb = _cdiv(B, tb)

    # ---- per-channel weight slabs (tiny): precompute scaled weights --------
    w_f32 = w.astype(jnp.float32)
    w_half = 0.5 * w_f32
    w_width = jnp.asarray(widths, dtype=jnp.float32)[:, None] * w_f32
    v1_f32 = v1.astype(jnp.float32)
    Cpad = nc * tc                      # pad only the KB-sized slabs, not x
    if Cpad != C:
        pad = ((0, 0), (0, Cpad - C))
        v1_f32 = jnp.pad(v1_f32, pad)
        w_half = jnp.pad(w_half, pad)
        w_width = jnp.pad(w_width, pad)

    kernel = functools.partial(_saaf_kernel, widths=widths, a0=bps[0])

    # Grid: channel is the OUTER axis so the v1/w slab blocks stay resident
    # across the inner batch sweep. x/out edge blocks may be ragged: for this
    # purely elementwise op the OOB input values are don't-care and OOB output
    # writes are dropped by Pallas.
    out = pl.pallas_call(
        kernel,
        out_shape=jax.ShapeDtypeStruct((B, C), x.dtype),
        grid_spec=pl.GridSpec(
            grid=(nc, nb),
            in_specs=[
                pl.BlockSpec((tb, tc), lambda c, b: (b, c)),      # x tile
                pl.BlockSpec((1, tc), lambda c, b: (0, c)),       # v1 slab
                pl.BlockSpec((n_seg, tc), lambda c, b: (0, c)),   # 0.5*w slab
                pl.BlockSpec((n_seg, tc), lambda c, b: (0, c)),   # width*w slab
            ],
            out_specs=pl.BlockSpec((tb, tc), lambda c, b: (b, c)),
        ),
        compiler_params=pltpu.CompilerParams(
            dimension_semantics=("parallel", "parallel"),
            vmem_limit_bytes=32 * 1024 * 1024,   # safe on v5e/v6e/v7x
        ),
    )(x, v1_f32, w_half, w_width)
    return out


def saaf_c2_ref(x, v1, w, breakpoints):
    """Pure-JAX reference (mirrors the PyTorch forward exactly)."""
    res = v1 * x
    n_seg = len(breakpoints) - 1
    for k in range(n_seg):
        a = breakpoints[k]
        b = breakpoints[k + 1]
        res = res + w[k, :] * jnp.where(
            x < a,
            0.0,
            jnp.where(x >= b, (b - a) ** 2 / 2.0 + (b - a) * (x - b), (x - a) ** 2 / 2.0),
        )
    return res


if __name__ == "__main__":
    key = jax.random.PRNGKey(0)

    breakpoints = [-2.0, -1.0, 0.0, 1.0, 2.0]   # n = 4 segments
    B, C = 13, 96                               # small, unaligned -> exercises ragged path

    k_x, k_v0, k_v1, k_w = jax.random.split(key, 4)
    x = jax.random.normal(k_x, (B, C), dtype=jnp.float32)
    v0 = jax.random.normal(k_v0, (1, C), dtype=jnp.float32)  # unused in forward (parity)
    v1 = jax.random.normal(k_v1, (1, C), dtype=jnp.float32)
    w = jax.random.normal(k_w, (len(breakpoints) - 1, C), dtype=jnp.float32)

    out = saaf_c2(x, v1, w, breakpoints)
    out = jax.block_until_ready(out)

    ref = saaf_c2_ref(x, v1, w, breakpoints)
    assert out.shape == ref.shape
    assert jnp.allclose(out, ref, atol=1e-5, rtol=1e-5), "mismatch vs reference"

    print("KERNEL_OK")
</pallas_src>

<mosaic_0001>
module attributes {stable_mosaic.version = 11 : i64} {
  func.func @_saaf_kernel(%arg0: i32, %arg1: i32, %arg2: memref<8x128xf32, #tpu.memory_space<vmem>>, %arg3: memref<1x128xf32, #tpu.memory_space<vmem>>, %arg4: memref<4x128xf32, #tpu.memory_space<vmem>>, %arg5: memref<4x128xf32, #tpu.memory_space<vmem>>, %arg6: memref<8x128xf32, #tpu.memory_space<vmem>>) attributes {dimension_semantics = [#tpu.dimension_semantics<parallel>, #tpu.dimension_semantics<parallel>], iteration_bounds = array<i64: 1, 2>, scalar_prefetch = 0 : i64, scratch_operands = 0 : i64, tpu.core_type = #tpu.core_type<tc>, window_params = [{transform_indices = @transform_0, window_bounds = array<i64: 8, 128>}, {transform_indices = @transform_1, window_bounds = array<i64: 1, 128>}, {transform_indices = @transform_2, window_bounds = array<i64: 4, 128>}, {transform_indices = @transform_3, window_bounds = array<i64: 4, 128>}, {transform_indices = @transform_4, window_bounds = array<i64: 8, 128>}]} {
    %c0 = arith.constant 0 : index
    %c0_0 = arith.constant 0 : index
    %0 = vector.load %arg2[%c0, %c0_0] : memref<8x128xf32, #tpu.memory_space<vmem>>, vector<8x128xf32>
    %c0_1 = arith.constant 0 : index
    %c0_2 = arith.constant 0 : index
    %1 = vector.load %arg3[%c0_1, %c0_2] : memref<1x128xf32, #tpu.memory_space<vmem>>, vector<1x128xf32>
    %2 = vector.broadcast %1 : vector<1x128xf32> to vector<8x128xf32>
    %3 = arith.mulf %2, %0 : vector<8x128xf32>
    %cst = arith.constant -2.000000e+00 : f32
    %4 = vector.broadcast %cst : f32 to vector<8x128xf32>
    %5 = arith.subf %0, %4 : vector<8x128xf32>
    %cst_3 = arith.constant 0.000000e+00 : f32
    %cst_4 = arith.constant 1.000000e+00 : f32
    %6 = vector.broadcast %cst_3 : f32 to vector<8x128xf32>
    %7 = arith.maximumf %6, %5 : vector<8x128xf32>
    %8 = vector.broadcast %cst_4 : f32 to vector<8x128xf32>
    %9 = arith.minimumf %8, %7 : vector<8x128xf32>
    %cst_5 = arith.constant 1.000000e+00 : f32
    %10 = vector.broadcast %cst_5 : f32 to vector<8x128xf32>
    %11 = arith.subf %5, %10 : vector<8x128xf32>
    %cst_6 = arith.constant 0.000000e+00 : f32
    %12 = vector.broadcast %cst_6 : f32 to vector<8x128xf32>
    %13 = arith.maximumf %11, %12 : vector<8x128xf32>
    %c0_7 = arith.constant 0 : index
    %c0_8 = arith.constant 0 : index
    %14 = vector.load %arg4[%c0_7, %c0_8] : memref<4x128xf32, #tpu.memory_space<vmem>>, vector<1x128xf32>
    %15 = arith.mulf %9, %9 : vector<8x128xf32>
    %16 = vector.broadcast %14 : vector<1x128xf32> to vector<8x128xf32>
    %17 = arith.mulf %16, %15 : vector<8x128xf32>
    %18 = arith.addf %3, %17 : vector<8x128xf32>
    %c0_9 = arith.constant 0 : index
    %c0_10 = arith.constant 0 : index
    %19 = vector.load %arg5[%c0_9, %c0_10] : memref<4x128xf32, #tpu.memory_space<vmem>>, vector<1x128xf32>
    %20 = vector.broadcast %19 : vector<1x128xf32> to vector<8x128xf32>
    %21 = arith.mulf %20, %13 : vector<8x128xf32>
    %22 = arith.addf %18, %21 : vector<8x128xf32>
    %cst_11 = arith.constant 1.000000e+00 : f32
    %23 = vector.broadcast %cst_11 : f32 to vector<8x128xf32>
    %24 = arith.minimumf %13, %23 : vector<8x128xf32>
    %cst_12 = arith.constant 1.000000e+00 : f32
    %25 = vector.broadcast %cst_12 : f32 to vector<8x128xf32>
    %26 = arith.subf %11, %25 : vector<8x128xf32>
    %cst_13 = arith.constant 0.000000e+00 : f32
    %27 = vector.broadcast %cst_13 : f32 to vector<8x128xf32>
    %28 = arith.maximumf %26, %27 : vector<8x128xf32>
    %c1 = arith.constant 1 : index
    %c0_14 = arith.constant 0 : index
    %29 = vector.load %arg4[%c1, %c0_14] : memref<4x128xf32, #tpu.memory_space<vmem>>, vector<1x128xf32>
    %30 = arith.mulf %24, %24 : vector<8x128xf32>
    %31 = vector.broadcast %29 : vector<1x128xf32> to vector<8x128xf32>
    %32 = arith.mulf %31, %30 : vector<8x128xf32>
    %33 = arith.addf %22, %32 : vector<8x128xf32>
    %c1_15 = arith.constant 1 : index
    %c0_16 = arith.constant 0 : index
    %34 = vector.load %arg5[%c1_15, %c0_16] : memref<4x128xf32, #tpu.memory_space<vmem>>, vector<1x128xf32>
    %35 = vector.broadcast %34 : vector<1x128xf32> to vector<8x128xf32>
    %36 = arith.mulf %35, %28 : vector<8x128xf32>
    %37 = arith.addf %33, %36 : vector<8x128xf32>
    %cst_17 = arith.constant 1.000000e+00 : f32
    %38 = vector.broadcast %cst_17 : f32 to vector<8x128xf32>
    %39 = arith.minimumf %28, %38 : vector<8x128xf32>
    %cst_18 = arith.constant 1.000000e+00 : f32
    %40 = vector.broadcast %cst_18 : f32 to vector<8x128xf32>
    %41 = arith.subf %26, %40 : vector<8x128xf32>
    %cst_19 = arith.constant 0.000000e+00 : f32
    %42 = vector.broadcast %cst_19 : f32 to vector<8x128xf32>
    %43 = arith.maximumf %41, %42 : vector<8x128xf32>
    %c2 = arith.constant 2 : index
    %c0_20 = arith.constant 0 : index
    %44 = vector.load %arg4[%c2, %c0_20] : memref<4x128xf32, #tpu.memory_space<vmem>>, vector<1x128xf32>
    %45 = arith.mulf %39, %39 : vector<8x128xf32>
    %46 = vector.broadcast %44 : vector<1x128xf32> to vector<8x128xf32>
    %47 = arith.mulf %46, %45 : vector<8x128xf32>
    %48 = arith.addf %37, %47 : vector<8x128xf32>
    %c2_21 = arith.constant 2 : index
    %c0_22 = arith.constant 0 : index
    %49 = vector.load %arg5[%c2_21, %c0_22] : memref<4x128xf32, #tpu.memory_space<vmem>>, vector<1x128xf32>
    %50 = vector.broadcast %49 : vector<1x128xf32> to vector<8x128xf32>
    %51 = arith.mulf %50, %43 : vector<8x128xf32>
    %52 = arith.addf %48, %51 : vector<8x128xf32>
    %cst_23 = arith.constant 1.000000e+00 : f32
    %53 = vector.broadcast %cst_23 : f32 to vector<8x128xf32>
    %54 = arith.minimumf %43, %53 : vector<8x128xf32>
    %cst_24 = arith.constant 1.000000e+00 : f32
    %55 = vector.broadcast %cst_24 : f32 to vector<8x128xf32>
    %56 = arith.subf %41, %55 : vector<8x128xf32>
    %cst_25 = arith.constant 0.000000e+00 : f32
    %57 = vector.broadcast %cst_25 : f32 to vector<8x128xf32>
    %58 = arith.maximumf %56, %57 : vector<8x128xf32>
    %c3 = arith.constant 3 : index
    %c0_26 = arith.constant 0 : index
    %59 = vector.load %arg4[%c3, %c0_26] : memref<4x128xf32, #tpu.memory_space<vmem>>, vector<1x128xf32>
    %60 = arith.mulf %54, %54 : vector<8x128xf32>
    %61 = vector.broadcast %59 : vector<1x128xf32> to vector<8x128xf32>
    %62 = arith.mulf %61, %60 : vector<8x128xf32>
    %63 = arith.addf %52, %62 : vector<8x128xf32>
    %c3_27 = arith.constant 3 : index
    %c0_28 = arith.constant 0 : index
    %64 = vector.load %arg5[%c3_27, %c0_28] : memref<4x128xf32, #tpu.memory_space<vmem>>, vector<1x128xf32>
    %65 = vector.broadcast %64 : vector<1x128xf32> to vector<8x128xf32>
    %66 = arith.mulf %65, %58 : vector<8x128xf32>
    %67 = arith.addf %63, %66 : vector<8x128xf32>
    %c0_29 = arith.constant 0 : index
    %c0_30 = arith.constant 0 : index
    %68 = vector.load %arg6[%c0_29, %c0_30] : memref<8x128xf32, #tpu.memory_space<vmem>>, vector<8x128xf32>
    tpu.vector_store %arg6[%c0_29, %c0_30], %67 {strides = array<i32>} : memref<8x128xf32, #tpu.memory_space<vmem>>, vector<8x128xf32>,
    return
  }
  func.func @transform_0(%arg0: i32, %arg1: i32) -> (i32, i32) {
    %c0_i32 = arith.constant 0 : i32
    return %arg1, %arg0 : i32, i32
  }
  func.func @transform_1(%arg0: i32, %arg1: i32) -> (i32, i32) {
    %c0_i32 = arith.constant 0 : i32
    %c0_i32_0 = arith.constant 0 : i32
    return %c0_i32, %arg0 : i32, i32
  }
  func.func @transform_2(%arg0: i32, %arg1: i32) -> (i32, i32) {
    %c0_i32 = arith.constant 0 : i32
    %c0_i32_0 = arith.constant 0 : i32
    return %c0_i32, %arg0 : i32, i32
  }
  func.func @transform_3(%arg0: i32, %arg1: i32) -> (i32, i32) {
    %c0_i32 = arith.constant 0 : i32
    %c0_i32_0 = arith.constant 0 : i32
    return %c0_i32, %arg0 : i32, i32
  }
  func.func @transform_4(%arg0: i32, %arg1: i32) -> (i32, i32) {
    %c0_i32 = arith.constant 0 : i32
    return %arg1, %arg0 : i32, i32
  }
}

</mosaic_0001>

<bundles_post_ra>
// kernel: tpu_custom_call.1
= control target key start
LH: loop header
LB: loop body
LE: loop exit
PB: predicated region body
PF: predicated region fallthrough
CT: control target
= control target key end

     0   :  { %9 = vsyncpa [#allocation3], 0  ;;  %s1013_s0 = inlined_call_operand.hbm [shape: f32[13,96], index: 0, kind: input, shape index: {}]   ;;  %s1014_s1 = inlined_call_operand.hbm [shape: f32[1,128], index: 1, kind: input, shape index: {}]   ;;  %s1015_s2 = inlined_call_operand.hbm [shape: f32[4,128], index: 2, kind: input, shape index: {}]   ;;  %s1016_s3 = inlined_call_operand.hbm [shape: f32[4,128], index: 3, kind: input, shape index: {}]   ;;  %s1017_s4 = inlined_call_operand.hbm [shape: f32[13,96], index: 4, kind: output, shape index: {}]  }
   0x1   :  { %11 = vsyncpa [#allocation3 + $0x1], 0 }
   0x2   :  { %12 = vsyncpa [#allocation6], 0 }
   0x3   :  { %13 = vsyncpa [#allocation9], 0 }
   0x4   :  { %14 = vsyncpa [#allocation4], 0 }
   0x5   :  { %16 = vsyncpa [#allocation4 + $0x1], 0  ;;  %s850_s15 = smov 0   ;;  %s852_s16 = smov 0  }
   0x6   :  { %s854_s17 = smov 0   ;;  %s856_s18 = smov 0  }
   0x7   :  { %s858_s19 = smov 0   ;;  %s860_s20 = smov 0  }
   0x8 LB: > { %s484_s21 = sadd.s32 4294967295, %s820_s20   ;;  %s485_s22 = sadd.s32 4294967294, %s820_s20   ;;  %s820_s20 = sphi %s860_s20, %s22_s20   ;;  %s816_s19 = sphi %s858_s19, %s1029_s19   ;;  %s812_s18 = sphi %s856_s18, %s1028_s18   ;;  %s808_s17 = sphi %s854_s17, %s1027_s17   ;;  %s804_s16 = sphi %s852_s16, %s1026_s16   ;;  %s800_s15 = sphi %s850_s15, %s1025_s15  }
   0x9   : > { %p56_p0 = scmp.ne.s32.totalorder %s804_s16, %s800_s15  ;;  %p884_p1 = scmp.eq.s32.totalorder %s484_s21, 0 }
   0xa   : > { %p888_p2 = scmp.eq.s32.totalorder %s484_s21, 1  ;;  %p166_p3 = scmp.eq.s32.totalorder %s485_s22, 1 }
   0xb   : > { %p894_p4 = por %p884_p1, %p56_p0  ;;  %p486_p5 = scmp.ge.s32.totalorder %s820_s20, 1 }
   0xc   : > { %p899_p6 = por %p166_p3, %p56_p0  ;;  %p173_p7 = scmp.lt.s32.totalorder %s820_s20, 3 }
   0xd   : > { %s186_s29 = sshll.u32 %s1014_s1, 4  ;;  %p490_p9 = scmp.ge.s32.totalorder %s820_s20, 2  ;;  %s187_s29 = int_to_ptr.hbm [resolvable:$true] %s186_s29 }
   0xe   : > { %p907_p8 = pnand %p486_p5, %p173_p7  ;;  %s822_s5 = smov [#allocation5]  }
   0xf   : > { %s188_s6 = sshll.u32 %s822_s5, 4  ;;  %s200_s9 = sshll.u32 %s1015_s2, 4  ;;  %s189_s6 = int_to_ptr.vmem [resolvable:$true] %s188_s6  ;;  %s201_s9 = int_to_ptr.hbm [resolvable:$true] %s200_s9 }
  0x10   : > { %p524_p10 = pneg %p907_p8  ;;  %s214_s12 = sshll.u32 %s1016_s3, 4  ;;  %s215_s12 = int_to_ptr.hbm [resolvable:$true] %s214_s12 }
  0x11   : > { %s823_s13 = smov [#allocation7]   ;;  %s824_s21 = smov [#allocation8]  }
  0x12   : > { %p525_p11 = pnand %p524_p10, %p884_p1  ;;  %s202_s14 = sshll.u32 %s823_s13, 4  ;;  %s203_s14 = int_to_ptr.vmem [resolvable:$true] %s202_s14 }
  0x13   : > { %s216_s22 = sshll.u32 %s824_s21, 4  ;;  %s31_s27 = sadd.s32 1, %s816_s19  ;;  %s217_s22 = int_to_ptr.vmem [resolvable:$true] %s216_s22 }
  0x14   : > { %527 = dma.hbm_to_vmem [thread:$0]  (!%p525_p11), %s187_s29, 16, %s189_s6, [#allocation6]  }
  0x15   : > { %530 = dma.hbm_to_vmem [thread:$0]  (!%p525_p11), %s201_s9, 64, %s203_s14, [#allocation6]  }
  0x16   : > { %533 = dma.hbm_to_vmem [thread:$0]  (!%p525_p11), %s215_s12, 64, %s217_s22, [#allocation9]  }
  0x17   : > { %p32_p12 = scmp.ge.s32.totalorder %s31_s27, 2  ;;  %s43_s28 = sadd.s32 1, %s808_s17 }
  0x18   : > { %p50_p13 = scmp.ne.s32.totalorder %s808_s17, %s804_s16  ;;  %p51_p0 = scmp.eq.s32.totalorder %s820_s20, 0 }
  0x19   : > { %s1031_s27 = smov (%p32_p12, %s31_s27), 0  ;;  %p545_p7 = scmp.lt.s32.totalorder %s820_s20, 2 }
  0x1a   : > { %p929_p3 = por %p51_p0, %p50_p13  ;;  %p935_p5 = por %p888_p2, %p50_p13 }
  0x1b   : > { %s38_s6 = ssub.s32 %s816_s19, %s1031_s27  ;;  %s227_s7 = sand.u32 1, %s808_s17  }
  0x1c   : > { %p41_p10 = scmp.eq.s32.totalorder %s38_s6, 0  ;;  %s491_s8 = sshll.u32 %s227_s7, 3 }
  0x1d   : > { %s492_s10 = sshll.u32 %s816_s19, 3  ;;  %s231_s14 = scalar_lea.vmem [#allocation2], %s491_s8 }
  0x1e   : > { %s944_s9 = scalar_select %p41_p10, %s808_s17, %s43_s28  }
  0x1f   : > { %s236_s13 = scalar_lea.hbm %s1013_s0, %s492_s10  ;;  %s240_s21 = sshll.u32 %s231_s14, 4  ;;  %s241_s21 = int_to_ptr.vmem [resolvable:$true] %s240_s21 }
  0x20   : > { %s238_s24 = sshll.u32 %s236_s13, 4  ;;  %p535_p2 = pnand %p545_p7, %p929_p3  ;;  %s239_s24 = int_to_ptr.hbm [resolvable:$true] %s238_s24 }
  0x21   : > { %s228_s22 = scalar_lea.sflag [#allocation3], %s227_s7  ;;  %249 = sbr.rel (%p907_p8) target bundleno = 73 (0x49), region = 36 }
  0x22   : > { %537 = dma.hbm_to_vmem [thread:$0]  (!%p535_p2), %s239_s24, 128, %s241_s21, %s228_s22  }
  0x23   : > { %s955_s28 = sand.u32 (!%p907_p8), 1, %s804_s16  }
  0x24   : > { %s494_s6 = sshll.u32 (!%p907_p8), %s955_s28, 3  ;;  %s252_s8 = scalar_lea.sflag (!%p907_p8), [#allocation3], %s955_s28 }
  0x25   : > { %s255_s10 = scalar_lea.vmem (!%p907_p8), [#allocation2], %s494_s6 }
  0x26   : > { %783 = dma.done.wait (%p894_p4), %s252_s8, 128  }
  0x27   : > { %785 = vsyncadd (%p894_p4), %s252_s8, 4294967168 }
  0x28   : > { %787 = dma.done.wait (%p884_p1), [#allocation6], 80  }
  0x29   : > { %789 = vsyncadd (%p884_p1), [#allocation6], 4294967216 }
  0x2a   : > { %791 = dma.done.wait (%p884_p1), [#allocation9], 64  }
  0x2b   : > { %793 = vsyncadd (%p884_p1), [#allocation9], 4294967232  ;;  %v296_v0 = vld [vmem:[%s255_s10] sm:$0xff]  ;;  %v601_v2 = vld [vmem:[#allocation5] ss:$0 sm:$0xff]  ;;  %s505_s23 = sshll.u32 %s812_s18, 3 }
  0x2c   : > { %v499_v1 = vadd.f32 2.0, %v296_v0  ;;  %v602_v5 = vld [vmem:[#allocation7] ss:$0 sm:$0xff]  ;;  %v603_v6 = vld [vmem:[#allocation8] ss:$0 sm:$0xff]  ;;  %v301_v10 = vmul.f32 %v601_v2, %v296_v0  ;;  %s365_s29 = scalar_lea.hbm %s1017_s4, %s505_s23  ;;  %s295_s7 = scalar_lea.vmem [#allocation10], %s494_s6 }
  0x2d   : > { %v604_v14 = vld [vmem:[#allocation7 + $0x1] ss:$0 sm:$0xff]  ;;  %v605_v19 = vld [vmem:[#allocation8 + $0x1] ss:$0 sm:$0xff]  ;;  %v606_v25 = vld [vmem:[#allocation7 + $0x2] ss:$0 sm:$0xff] }
  0x2e   : > { %v303_v3 = vmax.f32 %v499_v1, 0.0  ;;  %v500_v4 = vadd.f32 -1.0, %v499_v1  ;;  %v607_v29 = vld [vmem:[#allocation8 + $0x2] ss:$0 sm:$0xff]  ;;  %v608_v34 = vld [vmem:[#allocation7 + $0x3] ss:$0 sm:$0xff] }
  0x2f   : > { %v609_v38 = vld [vmem:[#allocation8 + $0x3] ss:$0 sm:$0xff]  ;;  %s367_s11 = sshll.u32 %s295_s7, 4  ;;  %s369_s12 = sshll.u32 %s365_s29, 4  ;;  %s368_s11 = int_to_ptr.vmem [resolvable:$true] %s367_s11  ;;  %s370_s12 = int_to_ptr.hbm [resolvable:$true] %s369_s12 }
  0x30   : > { %v304_v7 = vmin.f32 %v303_v3, 1.0  ;;  %v306_v8 = vmax.f32 %v500_v4, 0.0  ;;  %v501_v9 = vadd.f32 -1.0, %v500_v4  ;;  %s354_s18 = scalar_lea.sflag [#allocation4], %s955_s28  ;;  %s744_s13 = sshra.s32 %s370_s12, 4  ;;  %s745_s13 = int_to_ptr.hbm [resolvable:$true] %s744_s13 }
  0x31   : > { %s746_s14 = scalar_lea.hbm %s745_s13, 8  ;;  %s750_s22 = scalar_lea.hbm %s1017_s4, 16 }
  0x32   : > { %v308_v11 = vmul.f32 %v304_v7, %v304_v7  ;;  %v316_v12 = vmin.f32 %v306_v8, 1.0  ;;  %v318_v13 = vmax.f32 %v501_v9, 0.0  ;;  %v502_v15 = vadd.f32 -1.0, %v501_v9  ;;  %p747_p1 = scmp.ne.s32.totalorder %s745_s13, %s746_s14  ;;  %p751_p11 = scmp.lt.s32.totalorder %s745_s13, %s1017_s4 }
  0x33   : > { %v314_v17 = vmul.f32 %v603_v6, %v306_v8  ;;  %p752_p12 = scmp.lt.s32.totalorder %s750_s22, %s746_s14 }
  0x34   : > { %v310_v16 = vmul.f32 %v602_v5, %v308_v11  ;;  %v320_v18 = vmul.f32 %v316_v12, %v316_v12  ;;  %v328_v20 = vmin.f32 %v318_v13, 1.0  ;;  %v330_v21 = vmax.f32 %v502_v15, 0.0  ;;  %p748_p4 = pnand %p747_p1, %p935_p5 }
  0x35   : > { %v326_v28 = vmul.f32 %v605_v19, %v318_v13  ;;  %v503_v30 = vadd.f32 -1.0, %v502_v15  ;;  %p753_p13 = por %p752_p12, %p751_p11 }
  0x36   : > { %v311_v22 = vadd.f32 %v310_v16, %v301_v10  ;;  %v322_v23 = vmul.f32 %v604_v14, %v320_v18  ;;  %v332_v24 = vmul.f32 %v328_v20, %v328_v20  ;;  %v340_v26 = vmin.f32 %v330_v21, 1.0  ;;  %p749_p8 = pneg %p748_p4 }
  0x37   : > { %v338_v36 = vmul.f32 %v607_v29, %v330_v21  ;;  %v342_v37 = vmax.f32 %v503_v30, 0.0 }
  0x38   : > { %v315_v27 = vadd.f32 %v314_v17, %v311_v22  ;;  %v334_v32 = vmul.f32 %v606_v25, %v332_v24  ;;  %v344_v33 = vmul.f32 %v340_v26, %v340_v26  ;;  %p754_p0 = pnand %p753_p13, %p749_p8 }
  0x39   : > { %v350_v42 = vmul.f32 %v609_v38, %v342_v37 }
  0x3a   : > { %v323_v31 = vadd.f32 %v322_v23, %v315_v27  ;;  %v346_v40 = vmul.f32 %v608_v34, %v344_v33 }
  0x3c   : > { %v327_v35 = vadd.f32 %v326_v28, %v323_v31 }
  0x3e   : > { %v335_v39 = vadd.f32 %v334_v32, %v327_v35 }
  0x40   : > { %v339_v41 = vadd.f32 %v338_v36, %v335_v39 }
  0x42   : > { %v347_v43 = vadd.f32 %v346_v40, %v339_v41 }
  0x44   : > { %v351_v44 = vadd.f32 %v350_v42, %v347_v43 }
  0x46   : > { %352 = vst [vmem:[%s295_s7] sm:$0xff] %v351_v44 }
  0x47   : > { %757 = shalt.err (!%p754_p0)
}
  0x48   : > { %522 = dma.vmem_to_hbm [thread:$0]  (%p935_p5), %s368_s11, 128, %s370_s12, %s354_s18  }
  0x49 PF: > { %s381_s28 = sand.u32 1, %s800_s15   ;;  %p539_p3 = pnand %p490_p9, %p899_p6 }
  0x4a   : > { %s382_s10 = scalar_lea.sflag [#allocation4], %s381_s28 }
  0x4b   : > { %p540_p7 = pneg %p539_p3 }
  0x4d   : > { %795 = dma.done.wait (%p540_p7), %s382_s10, 128  }
  0x4e   : > { %797 = vsyncadd (%p540_p7), %s382_s10, 4294967168  ;;  %s22_s20 = sadd.s32 1, %s820_s20   ;;  %s1025_s15 = smov %s804_s16 }
  0x4f   : > { %p19_p10 = scmp.ge.s32.totalorder %s22_s20, 4   ;;  %s1026_s16 = smov %s808_s17 }
  0x50   : > { %s1027_s17 = smov %s944_s9  ;;  %s1028_s18 = smov %s816_s19 }
  0x51   : > { %s1029_s19 = smov %s1031_s27  ;;  %21 = sbr.rel (!%p19_p10) target bundleno = 8 (0x8), region = 96 }
  0x56   :  { %388 = vsyncpa [#allocation3], 1 }
  0x57   :  { %390 = vsyncpa [#allocation3 + $0x1], 1 }
  0x58   :  { %391 = vsyncpa [#allocation6], 1 }
  0x59   :  { %392 = vsyncpa [#allocation9], 1 }
  0x5a   :  { %393 = vsyncpa [#allocation4], 1 }
  0x5b   :  { %395 = vsyncpa [#allocation4 + $0x1], 1 }

</bundles_post_ra>
